<compile_context>
chip_gen: v7x
topology: tpu7x:2x2x1
jax: 0.10.0
libtpu: 0.0.40
codegen_flags: <defaults>
</compile_context>

<pallas_src>
import jax
import jax.numpy as jnp
from jax.experimental import pallas as pl
from jax.experimental.pallas import tpu as pltpu


def _round_up(a: int, b: int) -> int:
    return ((a + b - 1) // b) * b


def _round_down(a: int, b: int) -> int:
    return (a // b) * b


def _make_kernel(nb: int, add_residual: bool, cast_dtype):
    def kernel(x_ref, w_ref, b_ref, o_ref):
        # x_ref/o_ref: (nb, C, T) tile; lane axis = spatial
        # w_ref:       (C_out, C_in) 1x1-conv weight (residual may be folded in)
        # b_ref:       (C_out, 1) f32 bias column, broadcasts across lanes
        w = w_ref[...]
        b = b_ref[...]
        for i in range(nb):  # tiny static unroll (nb is a handful of images)
            x = x_ref[i]                                              # (C, T)
            xm = x if cast_dtype is None else x.astype(cast_dtype)
            y = jnp.dot(w, xm, preferred_element_type=jnp.float32)    # fn(x): channel mix on MXU
            y = y + b
            if add_residual:
                y = y + x.astype(jnp.float32)                         # + x residual, kept in f32
            o_ref[i] = y.astype(o_ref.dtype)
    return kernel


def residual_conv1x1(x_nchw, weight_oi, bias_o, *, tile_hw=8192, use_bf16_matmul=None):
    """out = conv1x1(x) + x, matching Residual(nn.Conv2d(C, C, 1)) semantics.

    x_nchw:    (N, C, H, W)   native PyTorch layout, kept end-to-end (no transposes)
    weight_oi: (C_out, C_in)  Conv2d(C, C, 1) weight squeezed to 2-D
    bias_o:    (C_out,)
    tile_hw:   upper bound on the spatial (lane) tile; the actual tile is
               clamped by the per-generation VMEM budget.
    use_bf16_matmul: force/disable the bf16 MXU path; default = f32 input & C>=256.
    """
    N, C, H, W = x_nchw.shape
    HW = H * W
    dtype = x_nchw.dtype
    itemsize = jnp.dtype(dtype).itemsize

    # NCHW -> (N, C, HW) is a pure view: no data movement, no transposes.
    x3d = x_nchw.reshape(N, C, HW)

    # ---- matmul precision policy --------------------------------------------
    if use_bf16_matmul is None:
        use_bf16_matmul = (dtype == jnp.float32 and C >= 256)
    downcast = bool(use_bf16_matmul) and dtype == jnp.float32

    if downcast:
        # bf16 operands on the MXU, f32 accumulate; explicit f32 residual add.
        w_pass = weight_oi.astype(jnp.bfloat16)
        cast_dtype = jnp.bfloat16
        add_residual = True
    else:
        # Fold the residual into the weight: y = (W + I) @ x + b (one less VPU add,
        # x's vregs don't need to stay live across the matmul).
        w_pass = (weight_oi + jnp.eye(C, dtype=weight_oi.dtype)).astype(dtype)
        cast_dtype = None
        add_residual = False
    b_pass = bias_o.reshape(C, 1).astype(jnp.float32)

    # ---- VMEM-budget-aware spatial tile ---------------------------------------
    try:
        vmem_cap = int(pltpu.get_tpu_info().vmem_capacity_bytes)
    except Exception:
        vmem_cap = 64 * 1024 * 1024  # conservative fallback (v7x per-TC size)
    budget = vmem_cap // 2            # x/out double buffers get ~half of VMEM
    per_lane = 4 * C * itemsize       # 2 bufs * (x tile + out tile) bytes per lane

    if HW >= 128:
        max_tile = _round_down(HW, 128)                       # waste bounded by <128 lanes
        vmem_tile = max(128, _round_down(budget // per_lane, 128))
        tile = max(128, min(tile_hw, max_tile, vmem_tile))
    else:
        tile = HW                                             # full extent (< 1 vreg) is legal
    num_tiles = pl.cdiv(HW, tile)

    # v7x has 2 TensorCores: keep >= 2 parallel grid steps whenever possible.
    if N * num_tiles < 2 and tile >= 256:
        tile = _round_up(tile // 2, 128)
        num_tiles = pl.cdiv(HW, tile)

    # Tiny-spatial inputs: pack several images per grid step (amortize per-step
    # overhead) while keeping >= 2 grid steps and staying inside the VMEM budget.
    nb = 1
    if num_tiles == 1 and N > 1:
        max_nb = max(1, budget // max(1, per_lane * tile))
        for cand in range(min(N // 2, max_nb), 1, -1):
            if N % cand == 0:
                nb = cand
                break
    grid = (N // nb, num_tiles)

    # ---- explicit scoped-VMEM limit so big lane-dense tiles keep 2-deep buffers.
    w_bytes = C * C * jnp.dtype(w_pass.dtype).itemsize
    need = nb * tile * per_lane + 2 * (w_bytes + C * 4) + (1 << 20)
    vmem_limit = int(min(vmem_cap * 0.8, max(2 * need, 32 * 1024 * 1024)))

    cost = pl.CostEstimate(
        flops=2 * N * HW * C * C,
        transcendentals=0,
        bytes_accessed=2 * N * C * HW * itemsize + w_bytes + C * 4,
    )

    kernel = _make_kernel(nb, add_residual, cast_dtype)

    out3d = pl.pallas_call(
        kernel,
        out_shape=jax.ShapeDtypeStruct((N, C, HW), dtype),
        grid_spec=pltpu.PrefetchScalarGridSpec(
            num_scalar_prefetch=0,
            grid=grid,
            in_specs=[
                pl.BlockSpec((nb, C, tile), lambda n, t: (n, 0, t)),  # x tile (lane = spatial)
                pl.BlockSpec((C, C), lambda n, t: (0, 0)),            # weight, VMEM-resident
                pl.BlockSpec((C, 1), lambda n, t: (0, 0)),            # bias column
            ],
            out_specs=pl.BlockSpec((nb, C, tile), lambda n, t: (n, 0, t)),
        ),
        compiler_params=pltpu.CompilerParams(
            dimension_semantics=("parallel", "parallel"),
            vmem_limit_bytes=vmem_limit,
        ),
        cost_estimate=cost,
    )(x3d, w_pass, b_pass)

    return out3d.reshape(N, C, H, W)


if __name__ == "__main__":
    key = jax.random.PRNGKey(0)
    kx, kw, kb = jax.random.split(key, 3)

    N, C, H, W = 2, 8, 16, 16          # small NCHW input, consistent with the UNet usage
    x = jax.random.normal(kx, (N, C, H, W), dtype=jnp.float32)
    weight = jax.random.normal(kw, (C, C), dtype=jnp.float32) * 0.1   # Conv2d(C, C, 1) weight (squeezed)
    bias = jax.random.normal(kb, (C,), dtype=jnp.float32) * 0.1

    out = residual_conv1x1(x, weight, bias)
    out = jax.block_until_ready(out)

    # Reference: fn(x) + x in plain JAX (fn = 1x1 conv).
    ref = (
        jnp.einsum("nchw,oc->nohw", x, weight)
        + bias.reshape(1, C, 1, 1)
        + x
    )
    assert out.shape == (N, C, H, W)
    assert jnp.allclose(out, ref, atol=1e-5, rtol=1e-5), "mismatch vs reference"

    print("KERNEL_OK")
</pallas_src>

<mosaic_0001>
module attributes {stable_mosaic.version = 11 : i64} {
  func.func @kernel(%arg0: i32, %arg1: i32, %arg2: memref<1x8x256xf32, #tpu.memory_space<vmem>>, %arg3: memref<8x8xf32, #tpu.memory_space<vmem>>, %arg4: memref<8x1xf32, #tpu.memory_space<vmem>>, %arg5: memref<1x8x256xf32, #tpu.memory_space<vmem>>) attributes {dimension_semantics = [#tpu.dimension_semantics<parallel>, #tpu.dimension_semantics<parallel>], iteration_bounds = array<i64: 2, 1>, scalar_prefetch = 0 : i64, scratch_operands = 0 : i64, tpu.core_type = #tpu.core_type<tc>, window_params = [{transform_indices = @transform_0, window_bounds = array<i64: 1, 8, 256>}, {pipeline_mode = #tpu.pipeline_mode<synchronous>, transform_indices = @transform_1, window_bounds = array<i64: 8, 8>}, {pipeline_mode = #tpu.pipeline_mode<synchronous>, transform_indices = @transform_2, window_bounds = array<i64: 8, 1>}, {transform_indices = @transform_3, window_bounds = array<i64: 1, 8, 256>}]} {
    %c0 = arith.constant 0 : index
    %c0_0 = arith.constant 0 : index
    %0 = vector.load %arg3[%c0, %c0_0] : memref<8x8xf32, #tpu.memory_space<vmem>>, vector<8x8xf32>
    %c0_1 = arith.constant 0 : index
    %c0_2 = arith.constant 0 : index
    %1 = vector.load %arg4[%c0_1, %c0_2] : memref<8x1xf32, #tpu.memory_space<vmem>>, vector<8x1xf32>
    %c0_3 = arith.constant 0 : index
    %c0_4 = arith.constant 0 : index
    %c0_5 = arith.constant 0 : index
    %2 = vector.load %arg2[%c0_3, %c0_4, %c0_5] : memref<1x8x256xf32, #tpu.memory_space<vmem>>, vector<1x8x256xf32>
    %3 = vector.shape_cast %2 : vector<1x8x256xf32> to vector<8x256xf32>
    %cst = arith.constant dense<0.000000e+00> : vector<8x256xf32>
    %4 = tpu.matmul %0, %3, %cst {dimension_numbers = #tpu.dot_dimension_numbers<[1], [0], [0], [1], [0, 0, 1, 1], [], []>} : vector<8x8xf32>, vector<8x256xf32>, vector<8x256xf32> -> vector<8x256xf32>
    %5 = vector.broadcast %1 : vector<8x1xf32> to vector<8x256xf32>
    %6 = arith.addf %4, %5 : vector<8x256xf32>
    %c0_6 = arith.constant 0 : index
    %c0_7 = arith.constant 0 : index
    %c0_8 = arith.constant 0 : index
    %7 = vector.load %arg5[%c0_6, %c0_7, %c0_8] : memref<1x8x256xf32, #tpu.memory_space<vmem>>, vector<1x8x256xf32>
    %8 = vector.shape_cast %7 : vector<1x8x256xf32> to vector<8x256xf32>
    %9 = vector.shape_cast %6 : vector<8x256xf32> to vector<1x8x256xf32>
    tpu.vector_store %arg5[%c0_6, %c0_7, %c0_8], %9 {strides = array<i32>} : memref<1x8x256xf32, #tpu.memory_space<vmem>>, vector<1x8x256xf32>,
    return
  }
  func.func @transform_0(%arg0: i32, %arg1: i32) -> (i32, i32, i32) {
    %c0_i32 = arith.constant 0 : i32
    %c0_i32_0 = arith.constant 0 : i32
    return %arg0, %c0_i32, %arg1 : i32, i32, i32
  }
  func.func @transform_1(%arg0: i32, %arg1: i32) -> (i32, i32) {
    %c0_i32 = arith.constant 0 : i32
    %c0_i32_0 = arith.constant 0 : i32
    %c0_i32_1 = arith.constant 0 : i32
    return %c0_i32, %c0_i32_0 : i32, i32
  }
  func.func @transform_2(%arg0: i32, %arg1: i32) -> (i32, i32) {
    %c0_i32 = arith.constant 0 : i32
    %c0_i32_0 = arith.constant 0 : i32
    %c0_i32_1 = arith.constant 0 : i32
    return %c0_i32, %c0_i32_0 : i32, i32
  }
  func.func @transform_3(%arg0: i32, %arg1: i32) -> (i32, i32, i32) {
    %c0_i32 = arith.constant 0 : i32
    %c0_i32_0 = arith.constant 0 : i32
    return %arg0, %c0_i32, %arg1 : i32, i32, i32
  }
}

</mosaic_0001>

<bundles_post_ra>
// kernel: tpu_custom_call.1
= control target key start
LH: loop header
LB: loop body
LE: loop exit
PB: predicated region body
PF: predicated region fallthrough
CT: control target
= control target key end

     0   :  { %8 = vsyncpa [#allocation3], 0  ;;  %s793_s0 = inlined_call_operand.hbm [shape: f32[2,8,256], index: 0, kind: input, shape index: {}]   ;;  %s794_s1 = inlined_call_operand.vmem [shape: f32[8,8], index: 1, kind: input, shape index: {}]   ;;  %s795_s2 = inlined_call_operand.vmem [shape: f32[8,1], index: 2, kind: input, shape index: {}]   ;;  %s796_s3 = inlined_call_operand.hbm [shape: f32[2,8,256], index: 3, kind: output, shape index: {}]  }
   0x1   :  { %10 = vsyncpa [#allocation3 + $0x1], 0 }
   0x2   :  { %11 = vsyncpa [#allocation4], 0 }
   0x3   :  { %13 = vsyncpa [#allocation4 + $0x1], 0  ;;  %s615_s12 = smov 0   ;;  %s617_s13 = smov 0  }
   0x4   :  { %s619_s14 = smov 0   ;;  %s621_s15 = smov 0  }
   0x5   :  { %s623_s16 = smov 0   ;;  %s625_s17 = smov 0  }
   0x6 LB: > { %s394_s18 = sadd.s32 4294967295, %s589_s17   ;;  %s395_s19 = sadd.s32 4294967294, %s589_s17   ;;  %s589_s17 = sphi %s625_s17, %s19_s17   ;;  %s585_s16 = sphi %s623_s16, %s812_s16   ;;  %s581_s15 = sphi %s621_s15, %s811_s15   ;;  %s577_s14 = sphi %s619_s14, %s810_s14   ;;  %s573_s13 = sphi %s617_s13, %s809_s13   ;;  %s569_s12 = sphi %s615_s12, %s808_s12  }
   0x7   : > { %s31_s20 = sadd.s32 1, %s585_s16  ;;  %s40_s21 = sadd.s32 1, %s577_s14 }
   0x8   : > { %p33_p0 = scmp.ge.s32.totalorder %s31_s20, 2  ;;  %p47_p1 = scmp.ne.s32.totalorder %s577_s14, %s573_s13 }
   0x9   : > { %p48_p2 = scmp.eq.s32.totalorder %s589_s17, 0  ;;  %p53_p3 = scmp.ne.s32.totalorder %s573_s13, %s569_s12 }
   0xa   : > { %s814_s20 = smov (%p33_p0, %s31_s20), 0  ;;  %p54_p5 = scmp.eq.s32.totalorder %s394_s18, 0 }
   0xb   : > { %p656_p4 = por %p48_p2, %p47_p1  ;;  %s35_s23 = ssub.s32 %s585_s16, %s814_s20 }
   0xc   : > { %p121_p6 = scmp.eq.s32.totalorder %s394_s18, 1  ;;  %p38_p7 = scmp.eq.s32.totalorder %s35_s23, 0 }
   0xd   : > { %p662_p8 = por %p54_p5, %p53_p3  ;;  %p127_p10 = scmp.eq.s32.totalorder %s395_s19, 1 }
   0xe   : > { %p666_p9 = por %p121_p6, %p47_p1  ;;  %p424_p13 = scmp.lt.s32.totalorder %s589_s17, 2 }
   0xf   : > { %s671_s26 = scalar_select %p38_p7, %s577_s14, %s40_s21  }
  0x10   : > { %s800_s25 = scalar_select %p666_p9, 1, 0 }
  0x11   : > { %p673_p11 = por %p127_p10, %p53_p3  ;;  %s153_s28 = sand.u32 1, %s577_s14  }
  0x12   : > { %s398_s29 = sshll.u32 %s153_s28, 4  ;;  %s410_s30 = sshll.u32 %s585_s16, 8 }
  0x13   : > { %s801_s27 = scalar_select %p673_p11, 1, 0 }
  0x14   : > { %s684_s6 = scalar_lea.hbm %s793_s0, %s410_s30  ;;  %s157_s7 = scalar_lea.vmem [#allocation2], %s398_s29 }
  0x15   : > { %s167_s8 = sshll.u32 %s157_s7, 4  ;;  %p690_p0 = pnand %p424_p13, %p656_p4  ;;  %s686_s8 = int_to_ptr.vmem [resolvable:$true] %s167_s8 }
  0x16   : > { %s154_s10 = scalar_lea.sflag [#allocation3], %s153_s28  ;;  %s477_s11 = scalar_lea.hbm %s684_s6, 256 }
  0x17   : > { %p478_p3 = scmp.ne.s32.totalorder %s684_s6, %s477_s11  ;;  %p479_p5 = pneg %p690_p0 }
  0x18   : > { %s482_s21 = scalar_lea.hbm %s793_s0, 512  ;;  %p483_p4 = scmp.lt.u32.totalorder %s684_s6, %s793_s0 }
  0x19   : > { %p480_p6 = pnand %p479_p5, %p478_p3  ;;  %p484_p10 = scmp.lt.u32.totalorder %s482_s21, %s477_s11 }
  0x1a   : > { %p486_p12 = scmp.lt.u32.totalorder %s477_s11, %s684_s6 }
  0x1b   : > { %p481_p7 = pneg %p480_p6  ;;  %p485_p13 = por %p484_p10, %p483_p4 }
  0x1d   : > { %p487_p1 = por %p486_p12, %p485_p13 }
  0x1f   : > { %p488_p2 = pnand %p487_p1, %p481_p7 }
  0x21   : > { %491 = shalt.err (!%p488_p2)
}
  0x22   : > { %s492_s28 = scalar_lea.vmem %s686_s8, 256  ;;  %s591_s29 = smov [#allocation2]  }
  0x23   : > { %p493_p3 = scmp.ne.s32.totalorder %s686_s8, %s492_s28  ;;  %s497_s30 = sshll.u32 %s591_s29, 4  ;;  %s498_s30 = int_to_ptr.vmem [resolvable:$false] %s497_s30 }
  0x24   : > { %s499_s4 = scalar_lea.vmem %s498_s30, 512  ;;  %p500_p9 = scmp.lt.s32.totalorder %s686_s8, %s498_s30 }
  0x25   : > { %p495_p6 = pnand %p493_p3, %p479_p5  ;;  %p501_p4 = scmp.lt.s32.totalorder %s499_s4, %s492_s28 }
  0x27   : > { %p496_p11 = pneg %p495_p6  ;;  %p502_p10 = por %p501_p4, %p500_p9 }
  0x29   : > { %p503_p12 = pnand %p502_p10, %p496_p11 }
  0x2b   : > { %506 = shalt.err (!%p503_p12)
}
  0x2c   : > { %419 = dma.hbm_to_vmem [thread:$0]  (!%p690_p0), %s684_s6, 256, %s686_s8, %s154_s10  }
  0x2d   : > { %p803_p1 = scmp.lt.s32.totalorder %s589_s17, 3  ;;  %p804_p2 = scmp.ge.s32.totalorder %s589_s17, 1 }
  0x2f   : > { %p173_p5 = pnand %p804_p2, %p803_p1 }
  0x30   : > { %s726_s5 = sand.u32 (!%p173_p5), 1, %s573_s13  }
  0x31   : > { %176 = sbr.rel (%p173_p5) target bundleno = 290 (0x122), region = 32  ;;  %s402_s7 = sshll.u32 (!%p173_p5), %s726_s5, 4 }
  0x32   : > { %s179_s11 = scalar_lea.sflag (!%p173_p5), [#allocation3], %s726_s5  ;;  %s182_s18 = scalar_lea.vmem (!%p173_p5), [#allocation2], %s402_s7 }
  0x38   : > { %560 = dma.done.wait (%p662_p8), %s179_s11, 256  }
  0x39   : > { %562 = vsyncadd (%p662_p8), %s179_s11, 4294967040  ;;  %v592_v0 = vmov 0.0   ;;  %v593_v1 = vmov 0   ;;  %v210_v2 = vld [vmem:[%s182_s18 + $0x8] sm:$0xff]  ;;  %v209_v3 = vld [vmem:[%s182_s18] sm:$0xff]  ;;  %vm216_vm0 = vcmask 64512  }
  0x3a   : > { %284 = vmatprep.mubr.f32.mxu0 %v592_v0  ;;  %476 = vset.pattern.permute.xlu0 %v593_v1  ;;  %v207_v4 = vld [vmem:[%s794_s1] sm:$0xff]  ;;  %s411_s24 = sshll.u32 %s581_s15, 8  ;;  %s204_s19 = scalar_lea.vmem [#allocation5], %s402_s7 }
  0x3b   : > { %220 = vmatprep.subr.mxu0 %v210_v2  ;;  %v208_v5 = vld [vmem:[%s795_s2] sm:$0xff]  ;;  %s310_s21 = sshll.u32 %s204_s19, 4  ;;  %s744_s28 = scalar_lea.hbm %s796_s3, %s411_s24  ;;  %s746_s21 = int_to_ptr.vmem [resolvable:$true] %s310_s21 }
  0x3c   : > { %221 = vmatpush1.msra.mxu0 %v209_v3  ;;  %213 = vperm.xlu0 %476, %v208_v5   ;;  %s294_s29 = scalar_lea.sflag [#allocation4], %s726_s5  ;;  %s507_s15 = scalar_lea.vmem %s746_s21, 256 }
  0x3d   : > { %404 = vmatmul.mubr.msk.f32.vlgmr.msra.gmra.mrb[0].mxu0 %vm216_vm0, %v207_v4  ;;  %p508_p8 = scmp.ne.s32.totalorder %s746_s21, %s507_s15  ;;  %p805_p9 = scmp.ne.s32.totalorder %s800_s25, 0 }
  0x3e   : > { %s594_s30 = smov [#allocation5]  }
  0x3f   : > { %p509_p11 = pnand %p508_p8, %p805_p9  ;;  %s511_s4 = sshll.u32 %s594_s30, 4  ;;  %s512_s4 = int_to_ptr.vmem [resolvable:$false] %s511_s4 }
  0x40   : > { %s513_s7 = scalar_lea.vmem %s512_s4, 512  ;;  %p514_p7 = scmp.lt.s32.totalorder %s746_s21, %s512_s4 }
  0x41   : > { %p510_p0 = pneg %p509_p11  ;;  %p515_p13 = scmp.lt.s32.totalorder %s513_s7, %s507_s15 }
  0x43   : > { %p516_p3 = por %p515_p13, %p514_p7 }
  0x45   : > { %p517_p6 = pnand %p516_p3, %p510_p0 }
  0xbb   : > { %v214_v6 = vpop.permute.xlu0 %213 }
 0x110   : > { %v286_v7 = vpop.f32.mrb[0].mxu0 }
 0x111   : > { %v287_v8 = vadd.f32 %v286_v7, %v214_v6  ;;  %v288_v9 = vpop.f32.mrb[1].mxu0 }
 0x112   : > { %v289_v10 = vadd.f32 %v288_v9, %v214_v6 }
 0x113   : > { %291 = vst [vmem:[%s204_s19] sm:$0xff] %v287_v8 }
 0x114   : > { %292 = vst [vmem:[%s204_s19 + $0x8] sm:$0xff] %v289_v10 }
 0x115   : > { %520 = shalt.err (!%p517_p6)
}
 0x116   : > { %s521_s5 = scalar_lea.hbm %s744_s28, 256  ;;  %s525_s6 = scalar_lea.hbm %s796_s3, 512 }
 0x117   : > { %p522_p4 = scmp.ne.s32.totalorder %s744_s28, %s521_s5  ;;  %p526_p1 = scmp.lt.u32.totalorder %s744_s28, %s796_s3 }
 0x118   : > { %p527_p2 = scmp.lt.u32.totalorder %s525_s6, %s521_s5  ;;  %p529_p8 = scmp.lt.u32.totalorder %s521_s5, %s744_s28 }
 0x119   : > { %p523_p10 = pnand %p522_p4, %p805_p9 }
 0x11a   : > { %p528_p5 = por %p527_p2, %p526_p1 }
 0x11b   : > { %p524_p12 = pneg %p523_p10 }
 0x11c   : > { %p530_p11 = por %p529_p8, %p528_p5 }
 0x11e   : > { %p531_p0 = pnand %p530_p11, %p524_p12 }
 0x120   : > { %534 = shalt.err (!%p531_p0)
}
 0x121   : > { %414 = dma.vmem_to_hbm [thread:$0]  (%p805_p9), %s746_s21, 256, %s744_s28, %s294_s29  }
 0x122 PF: > { %s322_s10 = sand.u32 1, %s569_s12   ;;  %p806_p7 = scmp.ne.s32.totalorder %s801_s27, 0 }
 0x123   : > { %p807_p13 = scmp.ge.s32.totalorder %s589_s17, 2  ;;  %s323_s24 = scalar_lea.sflag [#allocation4], %s322_s10 }
 0x125   : > { %p421_p3 = pnand %p807_p13, %p806_p7 }
 0x127   : > { %564 = dma.done.wait (!%p421_p3), %s323_s24, 256  }
 0x128   : > { %566 = vsyncadd (!%p421_p3), %s323_s24, 4294967040  ;;  %s19_s17 = sadd.s32 1, %s589_s17   ;;  %s808_s12 = smov %s573_s13 }
 0x129   : > { %p16_p6 = scmp.ge.s32.totalorder %s19_s17, 4   ;;  %s809_s13 = smov %s577_s14 }
 0x12a   : > { %s810_s14 = smov %s671_s26  ;;  %s811_s15 = smov %s585_s16 }
 0x12b   : > { %s812_s16 = smov %s814_s20  ;;  %18 = sbr.rel (!%p16_p6) target bundleno = 6 (0x6), region = 77 }
 0x132   :  { %328 = vsyncpa [#allocation3], 1 }
 0x133   :  { %330 = vsyncpa [#allocation3 + $0x1], 1 }
 0x134   :  { %331 = vsyncpa [#allocation4], 1 }
 0x135   :  { %333 = vsyncpa [#allocation4 + $0x1], 1 }

</bundles_post_ra>
